<compile_context>
chip_gen: v5e
topology: v5e:2x2
jax: 0.10.0
libtpu: 0.0.40
codegen_flags: <defaults>
</compile_context>

<pallas_src>
import functools

import jax
import jax.numpy as jnp
from jax.experimental import pallas as pl
from jax.experimental.pallas import tpu as pltpu


def _round_up(x, m):
    return ((x + m - 1) // m) * m


def _cdiv(a, b):
    return (a + b - 1) // b


def _pick_vmem_limit(est_bytes):
    """VMEM limit: enough for the tiles (with margin), capped at 3/4 physical."""
    phys = 64 * 1024 * 1024                      # conservative floor (v7x)
    try:
        phys = pltpu.get_tpu_info().vmem_capacity_bytes
    except Exception:
        pass
    cap = (3 * phys) // 4
    want = max(32 * 1024 * 1024, 3 * int(est_bytes))
    return int(min(cap, want))


def _conv_bn_relu_kernel(body_ref, halo_ref, w_ref, b_ref, o_ref, *,
                         kh, kw, th, w_out):
    """One (batch, row-tile) step: KHxKW conv + folded-BN bias + ReLU.

    body_ref: (1, TH, W+2p, Cin)        bf16  rows [t*TH, t*TH+TH) of padded x
    halo_ref: (1, 1, KH-1, W+2p, Cin)   bf16  the KH-1 rows below the body
    w_ref:    (KH, KW, Cin, Cout_pad)   bf16  conv weights, BN scale folded in
    b_ref:    (1, Cout_pad)             f32   folded BN bias
    o_ref:    (1, TH*W, Cout_pad)             output tile (lane-dense)
    """
    body = body_ref[0]                                   # (TH,   W+2p, Cin)
    halo = halo_ref[0, 0]                                # (KH-1, W+2p, Cin)
    slab = jnp.concatenate([body, halo], axis=0)         # (TH+KH-1, W+2p, Cin)
    cin = slab.shape[-1]
    cout = b_ref.shape[-1]

    # In-kernel im2col: KH*KW accumulating MXU dots off the VMEM slab.
    acc = jnp.zeros((th * w_out, cout), jnp.float32)
    for dy in range(kh):
        for dx in range(kw):
            tap = slab[dy:dy + th, dx:dx + w_out, :].reshape(th * w_out, cin)
            acc = acc + jnp.dot(tap, w_ref[dy, dx],
                                preferred_element_type=jnp.float32)

    # Folded-BN bias + ReLU epilogue in f32, cast on store.
    o_ref[0] = jnp.maximum(acc + b_ref[...], 0.0).astype(o_ref.dtype)


@functools.partial(jax.jit, static_argnames=("block_m", "out_dtype"))
def conv_bn_relu(x_nhwc, w_hwio, bn_scale, bn_bias, *,
                 block_m=2048, out_dtype=jnp.bfloat16):
    """ReLU(BN(conv_kxk_s1_'same'(x))), BN in inference (folded) form.

    x_nhwc: (N, H, W, Cin) f32;  w_hwio: (KH, KW, Cin, Cout) f32.
    Returns (N, H, W, Cout) in `out_dtype` (bf16 by default).
    """
    N, H, W, Cin = x_nhwc.shape
    KH, KW, _, Cout = w_hwio.shape
    assert KH == KW and KH % 2 == 1, "odd square kernel expected (module default 3x3)"
    pad = KH // 2                                  # stride 1, 'same' padding
    halo_rows = KH - 1

    LANE = 128
    Cout_pad = _round_up(Cout, LANE)
    W2 = W + 2 * pad
    out_itemsize = 2 if out_dtype in (jnp.bfloat16, jnp.float16) else 4

    # ---- row-tile selection -------------------------------------------------
    # Aim for ~block_m matmul rows per step, but keep the grid >= ~8 steps so
    # dual-TC chips (v7x) and the DMA pipeline have work; TH multiple of 8.
    target_th = max(8, block_m // max(W, 1))
    min_steps = 8
    want_ht = max(1, _cdiv(min_steps, N))
    cap_th = max(8, _cdiv(H, want_ht))
    TH = min(_round_up(min(target_th, cap_th), 8), _round_up(H, 8))
    HT = _cdiv(H, TH)
    Hp = HT * TH

    # ---- inputs: spatial zero-pad + bf16 (NO 9x im2col materialisation) -----
    x_b = x_nhwc.astype(jnp.bfloat16)
    x_slab = jnp.pad(x_b, ((0, 0), (pad, Hp - H + pad), (pad, pad), (0, 0)))
    # Halo: the KH-1 rows below each TH-row body tile (only 2/TH extra bytes).
    row_ids = (TH * (jnp.arange(HT) + 1))[:, None] + jnp.arange(halo_rows)[None, :]
    halo = jnp.take(x_slab, row_ids.reshape(-1), axis=1)
    halo = halo.reshape(N, HT, halo_rows, W2, Cin)

    # ---- weights: fold BN scale, pad Cout to lane width, bf16 ---------------
    w_f = w_hwio.astype(jnp.float32) * bn_scale.astype(jnp.float32)[None, None, None, :]
    w_f = jnp.pad(w_f, ((0, 0), (0, 0), (0, 0), (0, Cout_pad - Cout)))
    w_b = w_f.astype(jnp.bfloat16)
    bias2d = jnp.pad(bn_bias.astype(jnp.float32)[None, :],
                     ((0, 0), (0, Cout_pad - Cout)))

    # ---- VMEM footprint estimate / cost estimate ----------------------------
    in_bytes = TH * W2 * Cin * 2 + halo_rows * W2 * Cin * 2
    w_bytes = KH * KW * Cin * Cout_pad * 2 + Cout_pad * 4
    out_bytes = TH * W * Cout_pad * out_itemsize
    scratch_bytes = TH * W * Cout_pad * 4 + (TH + halo_rows) * W2 * Cin * 2
    est = 2 * (in_bytes + out_bytes) + 2 * w_bytes + scratch_bytes
    vmem_limit = _pick_vmem_limit(est)

    flops = 2 * N * H * W * KH * KW * Cin * Cout
    bytes_accessed = (x_slab.size * 2 + halo.size * 2 + w_b.size * 2
                      + bias2d.size * 4 + N * Hp * W * Cout_pad * out_itemsize)

    kernel = functools.partial(_conv_bn_relu_kernel, kh=KH, kw=KW, th=TH, w_out=W)

    out = pl.pallas_call(
        kernel,
        out_shape=jax.ShapeDtypeStruct((N, Hp * W, Cout_pad), out_dtype),
        grid_spec=pltpu.PrefetchScalarGridSpec(
            num_scalar_prefetch=0,
            grid=(N, HT),
            in_specs=[
                pl.BlockSpec((1, TH, W2, Cin), lambda n, t: (n, t, 0, 0)),
                pl.BlockSpec((1, 1, halo_rows, W2, Cin),
                             lambda n, t: (n, t, 0, 0, 0)),
                pl.BlockSpec((KH, KW, Cin, Cout_pad),
                             lambda n, t: (0, 0, 0, 0)),
                pl.BlockSpec((1, Cout_pad), lambda n, t: (0, 0)),
            ],
            out_specs=pl.BlockSpec((1, TH * W, Cout_pad), lambda n, t: (n, t, 0)),
        ),
        compiler_params=pltpu.CompilerParams(
            dimension_semantics=("parallel", "parallel"),
            vmem_limit_bytes=vmem_limit,
        ),
        cost_estimate=pl.CostEstimate(flops=flops, transcendentals=0,
                                      bytes_accessed=int(bytes_accessed)),
    )(x_slab, halo, w_b, bias2d)

    # Strip row/lane padding (no-op slices when H % TH == 0 and Cout % 128 == 0).
    out = out.reshape(N, Hp, W, Cout_pad)[:, :H, :, :Cout]
    return out


if __name__ == "__main__":
    key = jax.random.PRNGKey(0)
    N, Cin, H, W = 2, 4, 16, 16
    Cout, ks = 8, 3
    eps = 1e-5

    k_x, k_w, k_g, k_b, k_m, k_v = jax.random.split(key, 6)

    # PyTorch-convention input: NCHW.
    x_nchw = jax.random.normal(k_x, (N, Cin, H, W), dtype=jnp.float32)

    # Conv weight (OIHW), kaiming_normal_ with a=1 -> std = sqrt(1 / fan_in).
    fan_in = Cin * ks * ks
    w_oihw = jax.random.normal(k_w, (Cout, Cin, ks, ks), dtype=jnp.float32) * (
        1.0 / fan_in) ** 0.5

    # Deterministic BatchNorm parameters / running stats (inference mode).
    gamma = 1.0 + 0.1 * jax.random.normal(k_g, (Cout,), dtype=jnp.float32)
    beta = 0.1 * jax.random.normal(k_b, (Cout,), dtype=jnp.float32)
    running_mean = 0.1 * jax.random.normal(k_m, (Cout,), dtype=jnp.float32)
    running_var = jnp.abs(
        1.0 + 0.1 * jax.random.normal(k_v, (Cout,), dtype=jnp.float32))

    # Fold BN into scale / bias.
    bn_scale = gamma / jnp.sqrt(running_var + eps)
    bn_bias = beta - running_mean * bn_scale

    # Layout conversion (glue): NCHW -> NHWC, OIHW -> HWIO.
    x_nhwc = jnp.transpose(x_nchw, (0, 2, 3, 1))
    w_hwio = jnp.transpose(w_oihw, (2, 3, 1, 0))

    out = conv_bn_relu(x_nhwc, w_hwio, bn_scale, bn_bias)
    out = jax.block_until_ready(out)

    # Reference check (plain JAX / XLA conv, f32). Kernel matmuls run in bf16
    # with f32 accumulation and the output is bf16, so tolerance is loosened.
    ref = jax.lax.conv_general_dilated(
        x_nhwc, w_hwio, window_strides=(1, 1), padding=((1, 1), (1, 1)),
        dimension_numbers=("NHWC", "HWIO", "NHWC"))
    ref = jnp.maximum(ref * bn_scale + bn_bias, 0.0)

    out32 = out.astype(jnp.float32)
    assert out32.shape == ref.shape
    max_err = float(jnp.max(jnp.abs(out32 - ref)))
    assert jnp.allclose(out32, ref, atol=5e-2, rtol=5e-2), f"max_abs_err={max_err}"

    print("KERNEL_OK")
</pallas_src>

<mosaic_0001>
module attributes {stable_mosaic.version = 11 : i64} {
  func.func @_conv_bn_relu_kernel(%arg0: i32, %arg1: i32, %arg2: memref<1x8x18x4xbf16, #tpu.memory_space<vmem>>, %arg3: memref<1x1x2x18x4xbf16, #tpu.memory_space<vmem>>, %arg4: memref<3x3x4x128xbf16, #tpu.memory_space<vmem>>, %arg5: memref<1x128xf32, #tpu.memory_space<vmem>>, %arg6: memref<1x128x128xbf16, #tpu.memory_space<vmem>>) attributes {dimension_semantics = [#tpu.dimension_semantics<parallel>, #tpu.dimension_semantics<parallel>], iteration_bounds = array<i64: 2, 2>, scalar_prefetch = 0 : i64, scratch_operands = 0 : i64, tpu.core_type = #tpu.core_type<tc>, window_params = [{transform_indices = @transform_0, window_bounds = array<i64: 1, 8, 18, 4>}, {transform_indices = @transform_1, window_bounds = array<i64: 1, 1, 2, 18, 4>}, {pipeline_mode = #tpu.pipeline_mode<synchronous>, transform_indices = @transform_2, window_bounds = array<i64: 3, 3, 4, 128>}, {pipeline_mode = #tpu.pipeline_mode<synchronous>, transform_indices = @transform_3, window_bounds = array<i64: 1, 128>}, {transform_indices = @transform_4, window_bounds = array<i64: 1, 128, 128>}]} {
    %c0 = arith.constant 0 : index
    %c0_0 = arith.constant 0 : index
    %c0_1 = arith.constant 0 : index
    %c0_2 = arith.constant 0 : index
    %0 = vector.load %arg2[%c0, %c0_0, %c0_1, %c0_2] : memref<1x8x18x4xbf16, #tpu.memory_space<vmem>>, vector<1x8x18x4xbf16>
    %1 = vector.shape_cast %0 : vector<1x8x18x4xbf16> to vector<8x18x4xbf16>
    %c0_3 = arith.constant 0 : index
    %c0_4 = arith.constant 0 : index
    %c0_5 = arith.constant 0 : index
    %c0_6 = arith.constant 0 : index
    %c0_7 = arith.constant 0 : index
    %2 = vector.load %arg3[%c0_3, %c0_4, %c0_5, %c0_6, %c0_7] : memref<1x1x2x18x4xbf16, #tpu.memory_space<vmem>>, vector<1x1x2x18x4xbf16>
    %3 = vector.shape_cast %2 : vector<1x1x2x18x4xbf16> to vector<2x18x4xbf16>
    %4 = tpu.concatenate %1, %3 in 0 : vector<8x18x4xbf16>, vector<2x18x4xbf16> -> vector<10x18x4xbf16>
    %cst = arith.constant 0.000000e+00 : f32
    %5 = vector.broadcast %cst : f32 to vector<128x128xf32>
    %6 = vector.extract_strided_slice %4 {offsets = [0, 0, 0], sizes = [8, 16, 4], strides = [1, 1, 1]} : vector<10x18x4xbf16> to vector<8x16x4xbf16>
    %7 = vector.shape_cast %6 : vector<8x16x4xbf16> to vector<128x4xbf16>
    %c0_8 = arith.constant 0 : index
    %c0_9 = arith.constant 0 : index
    %c0_10 = arith.constant 0 : index
    %c0_11 = arith.constant 0 : index
    %8 = vector.load %arg4[%c0_8, %c0_9, %c0_10, %c0_11] : memref<3x3x4x128xbf16, #tpu.memory_space<vmem>>, vector<1x1x4x128xbf16>
    %9 = vector.shape_cast %8 : vector<1x1x4x128xbf16> to vector<4x128xbf16>
    %cst_12 = arith.constant dense<0.000000e+00> : vector<128x128xf32>
    %10 = tpu.matmul %7, %9, %cst_12 {dimension_numbers = #tpu.dot_dimension_numbers<[1], [0], [0], [1], [0, 0, 1, 1], [], []>} : vector<128x4xbf16>, vector<4x128xbf16>, vector<128x128xf32> -> vector<128x128xf32>
    %11 = arith.addf %5, %10 : vector<128x128xf32>
    %12 = vector.extract_strided_slice %4 {offsets = [0, 1, 0], sizes = [8, 16, 4], strides = [1, 1, 1]} : vector<10x18x4xbf16> to vector<8x16x4xbf16>
    %13 = vector.shape_cast %12 : vector<8x16x4xbf16> to vector<128x4xbf16>
    %c0_13 = arith.constant 0 : index
    %c1 = arith.constant 1 : index
    %c0_14 = arith.constant 0 : index
    %c0_15 = arith.constant 0 : index
    %14 = vector.load %arg4[%c0_13, %c1, %c0_14, %c0_15] : memref<3x3x4x128xbf16, #tpu.memory_space<vmem>>, vector<1x1x4x128xbf16>
    %15 = vector.shape_cast %14 : vector<1x1x4x128xbf16> to vector<4x128xbf16>
    %cst_16 = arith.constant dense<0.000000e+00> : vector<128x128xf32>
    %16 = tpu.matmul %13, %15, %cst_16 {dimension_numbers = #tpu.dot_dimension_numbers<[1], [0], [0], [1], [0, 0, 1, 1], [], []>} : vector<128x4xbf16>, vector<4x128xbf16>, vector<128x128xf32> -> vector<128x128xf32>
    %17 = arith.addf %11, %16 : vector<128x128xf32>
    %18 = vector.extract_strided_slice %4 {offsets = [0, 2, 0], sizes = [8, 16, 4], strides = [1, 1, 1]} : vector<10x18x4xbf16> to vector<8x16x4xbf16>
    %19 = vector.shape_cast %18 : vector<8x16x4xbf16> to vector<128x4xbf16>
    %c0_17 = arith.constant 0 : index
    %c2 = arith.constant 2 : index
    %c0_18 = arith.constant 0 : index
    %c0_19 = arith.constant 0 : index
    %20 = vector.load %arg4[%c0_17, %c2, %c0_18, %c0_19] : memref<3x3x4x128xbf16, #tpu.memory_space<vmem>>, vector<1x1x4x128xbf16>
    %21 = vector.shape_cast %20 : vector<1x1x4x128xbf16> to vector<4x128xbf16>
    %cst_20 = arith.constant dense<0.000000e+00> : vector<128x128xf32>
    %22 = tpu.matmul %19, %21, %cst_20 {dimension_numbers = #tpu.dot_dimension_numbers<[1], [0], [0], [1], [0, 0, 1, 1], [], []>} : vector<128x4xbf16>, vector<4x128xbf16>, vector<128x128xf32> -> vector<128x128xf32>
    %23 = arith.addf %17, %22 : vector<128x128xf32>
    %24 = vector.extract_strided_slice %4 {offsets = [1, 0, 0], sizes = [8, 16, 4], strides = [1, 1, 1]} : vector<10x18x4xbf16> to vector<8x16x4xbf16>
    %25 = vector.shape_cast %24 : vector<8x16x4xbf16> to vector<128x4xbf16>
    %c1_21 = arith.constant 1 : index
    %c0_22 = arith.constant 0 : index
    %c0_23 = arith.constant 0 : index
    %c0_24 = arith.constant 0 : index
    %26 = vector.load %arg4[%c1_21, %c0_22, %c0_23, %c0_24] : memref<3x3x4x128xbf16, #tpu.memory_space<vmem>>, vector<1x1x4x128xbf16>
    %27 = vector.shape_cast %26 : vector<1x1x4x128xbf16> to vector<4x128xbf16>
    %cst_25 = arith.constant dense<0.000000e+00> : vector<128x128xf32>
    %28 = tpu.matmul %25, %27, %cst_25 {dimension_numbers = #tpu.dot_dimension_numbers<[1], [0], [0], [1], [0, 0, 1, 1], [], []>} : vector<128x4xbf16>, vector<4x128xbf16>, vector<128x128xf32> -> vector<128x128xf32>
    %29 = arith.addf %23, %28 : vector<128x128xf32>
    %30 = vector.extract_strided_slice %4 {offsets = [1, 1, 0], sizes = [8, 16, 4], strides = [1, 1, 1]} : vector<10x18x4xbf16> to vector<8x16x4xbf16>
    %31 = vector.shape_cast %30 : vector<8x16x4xbf16> to vector<128x4xbf16>
    %c1_26 = arith.constant 1 : index
    %c1_27 = arith.constant 1 : index
    %c0_28 = arith.constant 0 : index
    %c0_29 = arith.constant 0 : index
    %32 = vector.load %arg4[%c1_26, %c1_27, %c0_28, %c0_29] : memref<3x3x4x128xbf16, #tpu.memory_space<vmem>>, vector<1x1x4x128xbf16>
    %33 = vector.shape_cast %32 : vector<1x1x4x128xbf16> to vector<4x128xbf16>
    %cst_30 = arith.constant dense<0.000000e+00> : vector<128x128xf32>
    %34 = tpu.matmul %31, %33, %cst_30 {dimension_numbers = #tpu.dot_dimension_numbers<[1], [0], [0], [1], [0, 0, 1, 1], [], []>} : vector<128x4xbf16>, vector<4x128xbf16>, vector<128x128xf32> -> vector<128x128xf32>
    %35 = arith.addf %29, %34 : vector<128x128xf32>
    %36 = vector.extract_strided_slice %4 {offsets = [1, 2, 0], sizes = [8, 16, 4], strides = [1, 1, 1]} : vector<10x18x4xbf16> to vector<8x16x4xbf16>
    %37 = vector.shape_cast %36 : vector<8x16x4xbf16> to vector<128x4xbf16>
    %c1_31 = arith.constant 1 : index
    %c2_32 = arith.constant 2 : index
    %c0_33 = arith.constant 0 : index
    %c0_34 = arith.constant 0 : index
    %38 = vector.load %arg4[%c1_31, %c2_32, %c0_33, %c0_34] : memref<3x3x4x128xbf16, #tpu.memory_space<vmem>>, vector<1x1x4x128xbf16>
    %39 = vector.shape_cast %38 : vector<1x1x4x128xbf16> to vector<4x128xbf16>
    %cst_35 = arith.constant dense<0.000000e+00> : vector<128x128xf32>
    %40 = tpu.matmul %37, %39, %cst_35 {dimension_numbers = #tpu.dot_dimension_numbers<[1], [0], [0], [1], [0, 0, 1, 1], [], []>} : vector<128x4xbf16>, vector<4x128xbf16>, vector<128x128xf32> -> vector<128x128xf32>
    %41 = arith.addf %35, %40 : vector<128x128xf32>
    %42 = vector.extract_strided_slice %4 {offsets = [2, 0, 0], sizes = [8, 16, 4], strides = [1, 1, 1]} : vector<10x18x4xbf16> to vector<8x16x4xbf16>
    %43 = vector.shape_cast %42 : vector<8x16x4xbf16> to vector<128x4xbf16>
    %c2_36 = arith.constant 2 : index
    %c0_37 = arith.constant 0 : index
    %c0_38 = arith.constant 0 : index
    %c0_39 = arith.constant 0 : index
    %44 = vector.load %arg4[%c2_36, %c0_37, %c0_38, %c0_39] : memref<3x3x4x128xbf16, #tpu.memory_space<vmem>>, vector<1x1x4x128xbf16>
    %45 = vector.shape_cast %44 : vector<1x1x4x128xbf16> to vector<4x128xbf16>
    %cst_40 = arith.constant dense<0.000000e+00> : vector<128x128xf32>
    %46 = tpu.matmul %43, %45, %cst_40 {dimension_numbers = #tpu.dot_dimension_numbers<[1], [0], [0], [1], [0, 0, 1, 1], [], []>} : vector<128x4xbf16>, vector<4x128xbf16>, vector<128x128xf32> -> vector<128x128xf32>
    %47 = arith.addf %41, %46 : vector<128x128xf32>
    %48 = vector.extract_strided_slice %4 {offsets = [2, 1, 0], sizes = [8, 16, 4], strides = [1, 1, 1]} : vector<10x18x4xbf16> to vector<8x16x4xbf16>
    %49 = vector.shape_cast %48 : vector<8x16x4xbf16> to vector<128x4xbf16>
    %c2_41 = arith.constant 2 : index
    %c1_42 = arith.constant 1 : index
    %c0_43 = arith.constant 0 : index
    %c0_44 = arith.constant 0 : index
    %50 = vector.load %arg4[%c2_41, %c1_42, %c0_43, %c0_44] : memref<3x3x4x128xbf16, #tpu.memory_space<vmem>>, vector<1x1x4x128xbf16>
    %51 = vector.shape_cast %50 : vector<1x1x4x128xbf16> to vector<4x128xbf16>
    %cst_45 = arith.constant dense<0.000000e+00> : vector<128x128xf32>
    %52 = tpu.matmul %49, %51, %cst_45 {dimension_numbers = #tpu.dot_dimension_numbers<[1], [0], [0], [1], [0, 0, 1, 1], [], []>} : vector<128x4xbf16>, vector<4x128xbf16>, vector<128x128xf32> -> vector<128x128xf32>
    %53 = arith.addf %47, %52 : vector<128x128xf32>
    %54 = vector.extract_strided_slice %4 {offsets = [2, 2, 0], sizes = [8, 16, 4], strides = [1, 1, 1]} : vector<10x18x4xbf16> to vector<8x16x4xbf16>
    %55 = vector.shape_cast %54 : vector<8x16x4xbf16> to vector<128x4xbf16>
    %c2_46 = arith.constant 2 : index
    %c2_47 = arith.constant 2 : index
    %c0_48 = arith.constant 0 : index
    %c0_49 = arith.constant 0 : index
    %56 = vector.load %arg4[%c2_46, %c2_47, %c0_48, %c0_49] : memref<3x3x4x128xbf16, #tpu.memory_space<vmem>>, vector<1x1x4x128xbf16>
    %57 = vector.shape_cast %56 : vector<1x1x4x128xbf16> to vector<4x128xbf16>
    %cst_50 = arith.constant dense<0.000000e+00> : vector<128x128xf32>
    %58 = tpu.matmul %55, %57, %cst_50 {dimension_numbers = #tpu.dot_dimension_numbers<[1], [0], [0], [1], [0, 0, 1, 1], [], []>} : vector<128x4xbf16>, vector<4x128xbf16>, vector<128x128xf32> -> vector<128x128xf32>
    %59 = arith.addf %53, %58 : vector<128x128xf32>
    %c0_51 = arith.constant 0 : index
    %c0_52 = arith.constant 0 : index
    %60 = vector.load %arg5[%c0_51, %c0_52] : memref<1x128xf32, #tpu.memory_space<vmem>>, vector<1x128xf32>
    %61 = vector.broadcast %60 : vector<1x128xf32> to vector<128x128xf32>
    %62 = arith.addf %59, %61 : vector<128x128xf32>
    %cst_53 = arith.constant 0.000000e+00 : f32
    %63 = vector.broadcast %cst_53 : f32 to vector<128x128xf32>
    %64 = arith.maximumf %62, %63 : vector<128x128xf32>
    %65 = arith.truncf %64 : vector<128x128xf32> to vector<128x128xbf16>
    %c0_54 = arith.constant 0 : index
    %c0_55 = arith.constant 0 : index
    %c0_56 = arith.constant 0 : index
    %66 = vector.load %arg6[%c0_54, %c0_55, %c0_56] : memref<1x128x128xbf16, #tpu.memory_space<vmem>>, vector<1x128x128xbf16>
    %67 = vector.shape_cast %66 : vector<1x128x128xbf16> to vector<128x128xbf16>
    %68 = vector.shape_cast %65 : vector<128x128xbf16> to vector<1x128x128xbf16>
    tpu.vector_store %arg6[%c0_54, %c0_55, %c0_56], %68 {strides = array<i32>} : memref<1x128x128xbf16, #tpu.memory_space<vmem>>, vector<1x128x128xbf16>,
    return
  }
  func.func @transform_0(%arg0: i32, %arg1: i32) -> (i32, i32, i32, i32) {
    %c0_i32 = arith.constant 0 : i32
    %c0_i32_0 = arith.constant 0 : i32
    %c0_i32_1 = arith.constant 0 : i32
    return %arg0, %arg1, %c0_i32, %c0_i32_0 : i32, i32, i32, i32
  }
  func.func @transform_1(%arg0: i32, %arg1: i32) -> (i32, i32, i32, i32, i32) {
    %c0_i32 = arith.constant 0 : i32
    %c0_i32_0 = arith.constant 0 : i32
    %c0_i32_1 = arith.constant 0 : i32
    %c0_i32_2 = arith.constant 0 : i32
    return %arg0, %arg1, %c0_i32, %c0_i32_0, %c0_i32_1 : i32, i32, i32, i32, i32
  }
  func.func @transform_2(%arg0: i32, %arg1: i32) -> (i32, i32, i32, i32) {
    %c0_i32 = arith.constant 0 : i32
    %c0_i32_0 = arith.constant 0 : i32
    %c0_i32_1 = arith.constant 0 : i32
    %c0_i32_2 = arith.constant 0 : i32
    %c0_i32_3 = arith.constant 0 : i32
    return %c0_i32, %c0_i32_0, %c0_i32_1, %c0_i32_2 : i32, i32, i32, i32
  }
  func.func @transform_3(%arg0: i32, %arg1: i32) -> (i32, i32) {
    %c0_i32 = arith.constant 0 : i32
    %c0_i32_0 = arith.constant 0 : i32
    %c0_i32_1 = arith.constant 0 : i32
    return %c0_i32, %c0_i32_0 : i32, i32
  }
  func.func @transform_4(%arg0: i32, %arg1: i32) -> (i32, i32, i32) {
    %c0_i32 = arith.constant 0 : i32
    %c0_i32_0 = arith.constant 0 : i32
    return %arg0, %arg1, %c0_i32 : i32, i32, i32
  }
}

</mosaic_0001>

<bundles_post_ra>
// kernel: conv_bn_relu.1
= control target key start
LH: loop header
LB: loop body
LE: loop exit
PB: predicated region body
PF: predicated region fallthrough
CT: control target
= control target key end

     0   :  { %s1950_s15 = smov 0   ;;  %s1952_s16 = smov 0   ;;  %s2613_s0 = inlined_call_operand.vmem [shape: bf16[2,18,18,4], index: 0, kind: input, shape index: {}]   ;;  %s2614_s1 = inlined_call_operand.vmem [shape: bf16[2,2,2,18,4], index: 1, kind: input, shape index: {}]   ;;  %s2615_s2 = inlined_call_operand.vmem [shape: bf16[3,3,4,128], index: 2, kind: input, shape index: {}]   ;;  %s2616_s3 = inlined_call_operand.vmem [shape: f32[1,128], index: 3, kind: input, shape index: {}]   ;;  %s2617_s4 = inlined_call_operand.vmem [shape: bf16[2,256,128], index: 4, kind: output, shape index: {}]  }
   0x1   :  { %s1954_s17 = smov 0   ;;  %s1956_s18 = smov 0  }
   0x2   :  { %s1958_s19 = smov 0  }
   0x3 LB: > { %s23_s20 = sadd.s32 1, %s1915_s17  ;;  %s26_s21 = sadd.s32 1, %s1919_s18  ;;  %s1923_s19 = sphi %s1958_s19, %s14_s19   ;;  %s1919_s18 = sphi %s1956_s18, %s2625_s18   ;;  %s1915_s17 = sphi %s1954_s17, %s2624_s17   ;;  %s1911_s16 = sphi %s1952_s16, %s2623_s16   ;;  %s1907_s15 = sphi %s1950_s15, %s2622_s15  }
   0x4   : > { %p24_p0 = scmp.ge.s32.totalorder %s23_s20, 2  ;;  %p1641_p1 = scmp.ge.s32.totalorder %s1923_s19, 1 }
   0x5   : > { %p210_p2 = scmp.lt.s32.totalorder %s1923_s19, 5 }
   0x6   : > { %s2627_s20 = smov (%p24_p0, %s23_s20), 0  ;;  %s2629_s21 = smov (!%p24_p0, %s26_s21), %s1919_s18 }
   0x7   : > { %p211_p3 = pnand %p1641_p1, %p210_p2  ;;  %p28_p4 = scmp.ge.s32.totalorder %s2629_s21, 2 }
   0x8   : > { %s1642_s24 = sshll.u32 (!%p211_p3), %s1907_s15, 3  ;;  %p265_p5 = scmp.lt.s32.totalorder (!%p211_p3), %s1911_s16, 1 }
   0x9   : > { %s2631_s21 = smov (%p28_p4, %s2629_s21), 0  ;;  %214 = sbr.rel (%p211_p3) target bundleno = 470 (0x1d6), region = 36 }
   0xa   : > { %p267_p6 = scmp.lt.s32.totalorder (!%p211_p3), %s1642_s24, 17  ;;  %p282_p7 = scmp.lt.s32.totalorder (!%p211_p3), %s1907_s15, 1 }
   0xb   : > { %s1645_s11 = sshll.u32 (!%p211_p3), %s1907_s15, 4 }
   0xc   : > { %p292_p8 = scmp.lt.s32.totalorder (!%p211_p3), %s1645_s11, 31 }
   0xe   : > { %v1648_v0 = vld [vmem:[%s2615_s2 + $0x2] sm:$0x3]  ;;  %vm577_vm0 = vcmask 1041408   ;;  %s2633_s16 = smov (!%p265_p5, %s1911_s16), 1  ;;  %v1705_v2 = vld [vmem:[%s2615_s2 + $0x4] sm:$0x3] }
   0xf   : > { %v579_v1 = vsel %vm577_vm0, %v1648_v0, 0  ;;  %s2635_s24 = smov (!%p267_p6, %s1642_s24), 17  ;;  %v864_v3 = vsel %vm577_vm0, %v1705_v2, 0  ;;  %s1841_s27 = smul.u32 54, %s2633_s16  ;;  %v1714_v4 = vld [vmem:[%s2615_s2 + $0x6] sm:$0x3] }
  0x10   : > { %1837 = vmatpush.bf16.msra.mxu1 %v579_v1  ;;  %1838 = vmatpush.bf16.msra.mxu2 %v579_v1  ;;  %s1840_s28 = smul.u32 3, %s2635_s24  ;;  %v330_v5 = vld [vmem:[%s2615_s2] sm:$0x3]  ;;  %v1727_v6 = vld [vmem:[%s2615_s2 + $0x8] sm:$0x3]  ;;  %v942_v7 = vsel %vm577_vm0, %v1714_v4, 0 }
  0x11   : > { %1839 = vmatpush.bf16.msra.mxu3 %v579_v1  ;;  %588 = vmatpush.bf16.msra.mxu0 %v579_v1  ;;  %v695_v8 = vsel %vm577_vm0, %v330_v5, 0  ;;  %v1042_v9 = vsel %vm577_vm0, %v1727_v6, 0  ;;  %vm331_vm1 = vsmask.f32 3328  ;;  %vm332_vm2 = vsmask.f32 7440 }
  0x12   : > { %s271_s9 = sadd.s32 %s1841_s27, %s1840_s28  ;;  %vm552_vm3 = vcmask 31744   ;;  %vm2047_vm4 = vmor %vm331_vm1, %vm332_vm2  ;;  %vm754_vm5 = vcmask 1042432   ;;  %vm755_vm6 = vcmask 1046532   ;;  %s1843_s5 = smul.u32 12, %s2633_s16 }
  0x13   : > { %s1643_s10 = sshll.u32 %s271_s9, 2  ;;  %vm2201_vm7 = vmor %vm754_vm5, %vm755_vm6  ;;  %s2637_s11 = smov (!%p292_p8, %s1645_s11), 31 }
  0x14   : > { %873 = vmatpush.bf16.msrb.mxu2 %v864_v3  ;;  %704 = vmatpush.bf16.msrb.mxu1 %v695_v8  ;;  %s2009_s13 = scalar_lea.vmem %s2613_s0, %s1643_s10  ;;  %s1646_s14 = sshll.u32 %s2633_s16, 5 }
  0x15   : > { %951 = vmatpush.bf16.msrb.mxu3 %v942_v7  ;;  %1051 = vmatpush.bf16.msrb.mxu0 %v1042_v9  ;;  %v2012_v10 = vld [vmem:[%s2009_s13 + $0x18] sm:$0xf]  ;;  %v2015_v11 = vld [vmem:[%s2009_s13 + $0x1c] sm:$0xf]  ;;  %v2018_v12 = vld [vmem:[%s2009_s13 + $0x20] sm:$0x1] }
  0x16   : > { %v383_v13 = vshrl.u32 %v2012_v10, 16  ;;  %v386_v14 = vshll.u32 %v2012_v10, 16  ;;  %v392_v15 = vshll.u32 %v2015_v11, 16  ;;  %v396_v16 = vshrl.u32 %v2015_v11, 16  ;;  %v2025_v17 = vld [vmem:[%s2009_s13 + $0x30] sm:$0xf] }
  0x17   : > { %v402_v18 = vshll.u32 %v2018_v12, 16  ;;  %v2029_v19 = vld [vmem:[%s2009_s13 + $0x34] sm:$0xf]  ;;  %v2032_v20 = vld [vmem:[%s2009_s13 + $0x38] sm:$0x1]  ;;  %v431_v21 = vshrl.u32 %v2025_v17, 16 }
  0x18   : > { %v385_v22 = vrot.slane %v383_v13, 4  ;;  %v388_v23 = vrot.slane %v386_v14, 5  ;;  %v394_v24 = vrot.slane %v392_v15, 5  ;;  %v398_v25 = vrot.slane %v396_v16, 4  ;;  %v2036_v26 = vld [vmem:[%s2009_s13 + $0x48] sm:$0xf] }
  0x19   : > { %v404_v27 = vrot.slane %v402_v18, 5  ;;  %v433_v28 = vrot.slane %v431_v21, 4  ;;  %v434_v29 = vshll.u32 %v2025_v17, 16  ;;  %v440_v30 = vshll.u32 %v2029_v19, 16  ;;  %v2043_v35 = vld [vmem:[%s2009_s13 + $0x4c] sm:$0xf] }
  0x1a   : > { %v389_v31 = vor.u32 %v388_v23, %v385_v22  ;;  %v399_v32 = vor.u32 %v398_v25, %v394_v24  ;;  %v444_v33 = vshrl.u32 %v2029_v19, 16  ;;  %v450_v34 = vshll.u32 %v2032_v20, 16  ;;  %v2054_v46 = vld [vmem:[%s2009_s13 + $0x50] sm:$0x1]  ;;  %v2063_v54 = vld [vmem:[%s2009_s13] sm:$0xf] }
  0x1b   : > { %v436_v37 = vrot.slane %v434_v29, 5  ;;  %v442_v38 = vrot.slane %v440_v30, 5  ;;  %v479_v39 = vshrl.u32 %v2036_v26, 16  ;;  %v482_v40 = vshll.u32 %v2036_v26, 16  ;;  %v2071_v2 = vld [vmem:[%s2009_s13 + $0x4] sm:$0xf] }
  0x1c   : > { %v390_v41 = vrot.slane %v389_v31, 4  ;;  %v400_v42 = vrot.slane %v399_v32, 4  ;;  %v446_v43 = vrot.slane %v444_v33, 4  ;;  %v452_v44 = vrot.slane %v450_v34, 5  ;;  %v2077_v8 = vld [vmem:[%s2009_s13 + $0x8] sm:$0x1] }
  0x1d   : > { %v437_v45 = vor.u32 %v436_v37, %v433_v28  ;;  %v481_v47 = vrot.slane %v479_v39, 4  ;;  %v484_v48 = vrot.slane %v482_v40, 5  ;;  %v488_v49 = vshll.u32 %v2043_v35, 16  ;;  %v2085_v16 = vld [vmem:[%s2009_s13 + $0x24] sm:$0xf]  ;;  %s283_s29 = scalar_select %p282_p7, %s1907_s15, 1 }
  0x1e   : > { %v395_v50 = vsel %vm2047_vm4, %v390_v41, %v394_v24  ;;  %v405_v51 = vsel %vm2047_vm4, %v400_v42, %v404_v27  ;;  %v447_v52 = vor.u32 %v446_v43, %v442_v38  ;;  %v492_v53 = vshrl.u32 %v2043_v35, 16  ;;  %v2094_v29 = vld [vmem:[%s2009_s13 + $0x28] sm:$0xf]  ;;  %v2099_v33 = vld [vmem:[%s2009_s13 + $0x2c] sm:$0x1]  ;;  %s295_s15 = sadd.s32 %s1646_s14, %s2637_s11 }
  0x1f   : > { %v532_v55 = vunpack.c.l.b16 %v395_v50  ;;  %v533_v56 = vunpack.c.l.b16 %v405_v51  ;;  %v438_v57 = vrot.slane %v437_v45, 4  ;;  %v485_v58 = vor.u32 %v484_v48, %v481_v47  ;;  %v2106_v41 = vld [vmem:[%s2009_s13 + $0x3c] sm:$0xf]  ;;  %s1842_s30 = smul.u32 6, %s283_s29  ;;  %s1647_s22 = sshll.u32 %s295_s15, 2 }
  0x20   : > { %v448_v59 = vrot.slane %v447_v52, 4  ;;  %v490_v60 = vrot.slane %v488_v49, 5  ;;  %v494_v61 = vrot.slane %v492_v53, 4  ;;  %v498_v62 = vshll.u32 %v2054_v46, 16  ;;  %s2561_s16 = scalar_lea.vmem %s2617_s4, %s1647_s22 }
  0x21   : > { %v2066_v63 = vpack.c.b16 %v533_v56, %v532_v55  ;;  %v443_v0 = vsel %vm2047_vm4, %v438_v57, %v442_v38  ;;  %v486_v1 = vrot.slane %v485_v58, 4  ;;  %v335_v3 = vshrl.u32 %v2063_v54, 16  ;;  %v2114_v55 = vld [vmem:[%s2009_s13 + $0x40] sm:$0xf]  ;;  %s286_s6 = sadd.s32 %s1843_s5, %s1842_s30 }
  0x22   : > { %v453_v4 = vsel %vm2047_vm4, %v448_v59, %v452_v44  ;;  %v536_v5 = vunpack.c.l.b16 %v443_v0  ;;  %v495_v6 = vor.u32 %v494_v61, %v490_v60  ;;  %v500_v7 = vrot.slane %v498_v62, 5  ;;  %v2126_v62 = vld [vmem:[%s2009_s13 + $0x54] sm:$0xf]  ;;  %s1644_s7 = sshll.u32 %s286_s6, 2 }
  0x23   : > { %1651 = vmatmul.msk.bf16.vlgmr.msra.gmra.mxu1 %vm552_vm3, %v2066_v63  ;;  %v537_v9 = vunpack.c.l.b16 %v453_v4  ;;  %v491_v13 = vsel %vm2047_vm4, %v486_v1, %v490_v60  ;;  %v337_v14 = vrot.slane %v335_v3, 4  ;;  %v338_v15 = vshll.u32 %v2063_v54, 16  ;;  %v2122_v60 = vld [vmem:[%s2009_s13 + $0x44] sm:$0x1]  ;;  %s2335_s10 = scalar_lea.vmem %s2614_s1, %s1644_s7 }
  0x24   : > { %v496_v18 = vrot.slane %v495_v6, 4  ;;  %v540_v21 = vunpack.c.l.b16 %v491_v13  ;;  %v344_v22 = vshll.u32 %v2071_v2, 16  ;;  %v348_v23 = vshrl.u32 %v2071_v2, 16 }
  0x25   : > { %v2089_v24 = vpack.c.b16 %v537_v9, %v536_v5  ;;  %v340_v25 = vrot.slane %v338_v15, 5  ;;  %v354_v27 = vshll.u32 %v2077_v8, 16  ;;  %v762_v28 = vrot.slane %v2077_v8, 5 }
  0x26   : > { %v501_v30 = vsel %vm2047_vm4, %v496_v18, %v500_v7  ;;  %v346_v31 = vrot.slane %v344_v22, 5  ;;  %v350_v32 = vrot.slane %v348_v23, 4  ;;  %v407_v34 = vshrl.u32 %v2085_v16, 16 }
  0x27   : > { %1653 = vmatmul.msk.bf16.vlgmr.msra.gmra.mxu2 %vm552_vm3, %v2089_v24  ;;  %v541_v37 = vunpack.c.l.b16 %v501_v30  ;;  %v341_v38 = vor.u32 %v340_v25, %v337_v14  ;;  %v356_v39 = vrot.slane %v354_v27, 5  ;;  %v410_v40 = vshll.u32 %v2085_v16, 16  ;;  %v2137_v27 = vld [vmem:[%s2009_s13 + $0x58] sm:$0xf]  ;;  %v2140_v30 = vld [vmem:[%s2009_s13 + $0x5c] sm:$0x1] }
  0x28   : > { %v351_v42 = vor.u32 %v350_v32, %v346_v31  ;;  %v409_v43 = vrot.slane %v407_v34, 4  ;;  %v416_v44 = vshll.u32 %v2094_v29, 16  ;;  %v420_v45 = vshrl.u32 %v2094_v29, 16 }
  0x29   : > { %v2110_v47 = vpack.c.b16 %v541_v37, %v540_v21  ;;  %v342_v48 = vrot.slane %v341_v38, 4  ;;  %v412_v49 = vrot.slane %v410_v40, 5  ;;  %v426_v50 = vshll.u32 %v2099_v33, 16  ;;  %v2145_v38 = vld [vmem:[%s2009_s13 + $0xc] sm:$0xf] }
  0x2a   : > { %v352_v51 = vrot.slane %v351_v42, 4  ;;  %v418_v52 = vrot.slane %v416_v44, 5  ;;  %v422_v53 = vrot.slane %v420_v45, 4  ;;  %v455_v56 = vshrl.u32 %v2106_v41, 16 }
  0x2b   : > { %1655 = vmatmul.msk.bf16.vlgmr.msra.gmra.mxu3 %vm552_vm3, %v2110_v47  ;;  %v347_v57 = vsel %vm2047_vm4, %v342_v48, %v346_v31  ;;  %v413_v58 = vor.u32 %v412_v49, %v409_v43  ;;  %v428_v59 = vrot.slane %v426_v50, 5  ;;  %v458_v61 = vshll.u32 %v2106_v41, 16 }
  0x2c   : > { %v357_v0 = vsel %vm2047_vm4, %v352_v51, %v356_v39  ;;  %v528_v1 = vunpack.c.l.b16 %v347_v57  ;;  %v423_v3 = vor.u32 %v422_v53, %v418_v52  ;;  %v457_v4 = vrot.slane %v455_v56, 4  ;;  %v2157_v53 = vld [vmem:[%s2009_s13 + $0x10] sm:$0xf] }
  0x2d   : > { %v529_v5 = vunpack.c.l.b16 %v357_v0  ;;  %v414_v6 = vrot.slane %v413_v58, 4  ;;  %v460_v7 = vrot.slane %v458_v61, 5  ;;  %v464_v9 = vshll.u32 %v2114_v55, 16  ;;  %v2161_v0 = vld [vmem:[%s2009_s13 + $0x14] sm:$0x1] }
  0x2e   : > { %v424_v13 = vrot.slane %v423_v3, 4  ;;  %v468_v14 = vshrl.u32 %v2114_v55, 16  ;;  %v474_v15 = vshll.u32 %v2122_v60, 16  ;;  %v503_v18 = vshrl.u32 %v2126_v62, 16 }
  0x2f   : > { %v544_v21 = vpack.c.b16 %v529_v5, %v528_v1  ;;  %v419_v22 = vsel %vm2047_vm4, %v414_v6, %v418_v52  ;;  %v461_v23 = vor.u32 %v460_v7, %v457_v4  ;;  %v466_v25 = vrot.slane %v464_v9, 5 }
  0x30   : > { %v429_v31 = vsel %vm2047_vm4, %v424_v13, %v428_v59  ;;  %v534_v32 = vunpack.c.l.b16 %v419_v22  ;;  %v470_v34 = vrot.slane %v468_v14, 4  ;;  %v476_v37 = vrot.slane %v474_v15, 5 }
  0x31   : > { %1649 = vmatmul.msk.bf16.vlgmr.msra.gmra.mxu0 %vm552_vm3, %v544_v21  ;;  %v535_v39 = vunpack.c.l.b16 %v429_v31  ;;  %v462_v40 = vrot.slane %v461_v23, 4  ;;  %v505_v42 = vrot.slane %v503_v18, 4  ;;  %v506_v43 = vshll.u32 %v2126_v62, 16  ;;  %v1746_v31 = vld [vmem:[%s2615_s2 + $0xc] sm:$0x3] }
  0x32   : > { %v471_v44 = vor.u32 %v470_v34, %v466_v25  ;;  %v512_v45 = vshll.u32 %v2137_v27, 16  ;;  %v516_v48 = vshrl.u32 %v2137_v27, 16  ;;  %v522_v49 = vshll.u32 %v2140_v30, 16 }
  0x33   : > { %v2152_v50 = vpack.c.b16 %v535_v39, %v534_v32  ;;  %v467_v51 = vsel %vm2047_vm4, %v462_v40, %v466_v25  ;;  %v508_v52 = vrot.slane %v506_v43, 5  ;;  %v359_v56 = vshrl.u32 %v2145_v38, 16  ;;  %v1759_v40 = vld [vmem:[%s2615_s2 + $0xe] sm:$0x3] }
  0x34   : > { %v472_v57 = vrot.slane %v471_v44, 4  ;;  %v538_v58 = vunpack.c.l.b16 %v467_v51  ;;  %v514_v59 = vrot.slane %v512_v45, 5  ;;  %v518_v61 = vrot.slane %v516_v48, 4 }
  0x35   : > { %1652 = vmatmul.msk.bf16.gmra.mxu1 %vm552_vm3, %v2152_v50  ;;  %v509_v1 = vor.u32 %v508_v52, %v505_v42  ;;  %v524_v3 = vrot.slane %v522_v49, 5  ;;  %v361_v4 = vrot.slane %v359_v56, 4  ;;  %v362_v5 = vshll.u32 %v2145_v38, 16  ;;  %v1737_v42 = vld [vmem:[%s2615_s2 + $0xa] sm:$0x3] }
  0x36   : > { %v477_v6 = vsel %vm2047_vm4, %v472_v57, %v476_v37  ;;  %v519_v7 = vor.u32 %v518_v61, %v514_v59  ;;  %v368_v9 = vshll.u32 %v2157_v53, 16  ;;  %v372_v13 = vshrl.u32 %v2157_v53, 16  ;;  %v1769_v56 = vld [vmem:[%s2615_s2 + $0x10] sm:$0x3] }
  0x37   : > { %v539_v14 = vunpack.c.l.b16 %v477_v6  ;;  %v510_v15 = vrot.slane %v509_v1, 4  ;;  %v364_v18 = vrot.slane %v362_v5, 5  ;;  %v378_v21 = vshll.u32 %v2161_v0, 16 }
  0x38   : > { %v520_v22 = vrot.slane %v519_v7, 4  ;;  %v370_v23 = vrot.slane %v368_v9, 5  ;;  %v374_v25 = vrot.slane %v372_v13, 4  ;;  %v1697_v51 = vrot.slane %v2063_v54, 9 }
  0x39   : > { %v2174_v32 = vpack.c.b16 %v539_v14, %v538_v58  ;;  %v515_v34 = vsel %vm2047_vm4, %v510_v15, %v514_v59  ;;  %v365_v37 = vor.u32 %v364_v18, %v361_v4  ;;  %v380_v39 = vrot.slane %v378_v21, 5  ;;  %v1780_v15 = vld [vmem:[%s2009_s13] sm:$0xff] }
  0x3a   : > { %v525_v43 = vsel %vm2047_vm4, %v520_v22, %v524_v3  ;;  %v542_v44 = vunpack.c.l.b16 %v515_v34  ;;  %v375_v45 = vor.u32 %v374_v25, %v370_v23  ;;  %v759_v52 = vrot.slane %v2071_v2, 5 }
  0x3b   : > { %1654 = vmatmul.msk.bf16.gmra.mxu2 %vm552_vm3, %v2174_v32  ;;  %v543_v48 = vunpack.c.l.b16 %v525_v43  ;;  %v366_v49 = vrot.slane %v365_v37, 4  ;;  %v1204_v58 = vsel %vm577_vm0, %v1746_v31, 0  ;;  %v1304_v59 = vsel %vm577_vm0, %v1759_v40, 0 }
  0x3c   : > { %v376_v57 = vrot.slane %v375_v45, 4  ;;  %v1126_v61 = vsel %vm577_vm0, %v1737_v42, 0  ;;  %v761_v2 = vrot.slane %v759_v52, 4  ;;  %1213 = vmatpush.bf16.msra.mxu2 %v1204_v58  ;;  %1313 = vmatpush.bf16.msra.mxu3 %v1304_v59  ;;  %v1388_v6 = vsel %vm577_vm0, %v1769_v56, 0  ;;  %v1781_v42 = vld [vmem:[%s2009_s13 + $0xc] sm:$0xff] }
  0x3d   : > { %v2196_v1 = vpack.c.b16 %v543_v48, %v542_v44  ;;  %v371_v3 = vsel %vm2047_vm4, %v366_v49, %v370_v23  ;;  %1135 = vmatpush.bf16.msra.mxu1 %v1126_v61  ;;  %1397 = vmatpush.bf16.msra.mxu0 %v1388_v6  ;;  %v760_v9 = vsel %vm2201_vm7, %v1697_v51, %v759_v52  ;;  %v1699_v22 = vrot.slane %v2012_v10, 9 }
  0x3e   : > { %v381_v4 = vsel %vm2047_vm4, %v376_v57, %v380_v39  ;;  %v530_v5 = vunpack.c.l.b16 %v371_v3  ;;  %v763_v13 = vsel %vm2201_vm7, %v761_v2, %v762_v28  ;;  %v815_v18 = vunpack.c.l.b16 %v760_v9  ;;  %v2277_v3 = vld [vmem:[%s2009_s13 + $0x30] sm:$0xff] }
  0x3f   : > { %1656 = vmatmul.msk.bf16.gmra.mxu3 %vm552_vm3, %v2196_v1  ;;  %v531_v7 = vunpack.c.l.b16 %v381_v4  ;;  %v816_v21 = vunpack.c.l.b16 %v763_v13  ;;  %v773_v23 = vrot.slane %v2015_v11, 5  ;;  %v776_v25 = vrot.slane %v2018_v12, 5  ;;  %v2297_v13 = vld [vmem:[%s2009_s13 + $0x3c] sm:$0xff] }
  0x40   : > { %v766_v34 = vrot.slane %v2157_v53, 5  ;;  %v1698_v10 = vrot.slane %v2145_v38, 9  ;;  %v769_v12 = vrot.slane %v2161_v0, 5  ;;  %v1700_v38 = vrot.slane %v2085_v16, 9  ;;  %v2252_v16 = vld [vmem:[%s2009_s13 + $0x18] sm:$0xff] }
  0x41   : > { %v545_v14 = vpack.c.b16 %v531_v7, %v530_v5  ;;  %v831_v31 = vpack.c.b16 %v816_v21, %v815_v18  ;;  %v774_v8 = vsel %vm2201_vm7, %v1699_v22, %v773_v23  ;;  %v775_v28 = vrot.slane %v773_v23, 4 }
  0x42   : > { %v819_v37 = vunpack.c.l.b16 %v774_v8  ;;  %v768_v11 = vrot.slane %v766_v34, 4  ;;  %v767_v53 = vsel %vm2201_vm7, %v1698_v10, %v766_v34  ;;  %v780_v0 = vrot.slane %v2094_v29, 5 }
  0x43   : > { %1650 = vmatmul.msk.bf16.gmra.mxu0 %vm552_vm3, %v545_v14  ;;  %v777_v39 = vsel %vm2201_vm7, %v775_v28, %v776_v25  ;;  %v817_v45 = vunpack.c.l.b16 %v767_v53  ;;  %v783_v49 = vrot.slane %v2099_v33, 5  ;;  %v2265_v33 = vld [vmem:[%s2009_s13 + $0x24] sm:$0xff]  ;;  %v787_v61 = vrot.slane %v2029_v19, 5 }
  0x44   : > { %v820_v40 = vunpack.c.l.b16 %v777_v39  ;;  %v770_v44 = vsel %vm2201_vm7, %v768_v11, %v769_v12  ;;  %v781_v52 = vsel %vm2201_vm7, %v1700_v38, %v780_v0  ;;  %v782_v56 = vrot.slane %v780_v0, 4  ;;  %v2320_v25 = vld [vmem:[%s2009_s13 + $0x48] sm:$0xff]  ;;  %v2340_v39 = vld [vmem:[%s2335_s10] sm:$0xf]  ;;  %v2361_v38 = vld [vmem:[%s2009_s13 + $0x54] sm:$0xff] }
  0x45   : > { %1689 = vmatmul.msk.bf16.vlgmr.msrb.gmra.mxu1 %vm552_vm3, %v1780_v15  ;;  %v818_v48 = vunpack.c.l.b16 %v770_v44  ;;  %v821_v57 = vunpack.c.l.b16 %v781_v52  ;;  %v1701_v2 = vrot.slane %v2025_v17, 9  ;;  %v789_v4 = vrot.slane %v787_v61, 4 }
  0x46   : > { %v2231_v43 = vpack.c.b16 %v820_v40, %v819_v37  ;;  %v784_v58 = vsel %vm2201_vm7, %v782_v56, %v783_v49  ;;  %v790_v5 = vrot.slane %v2032_v20, 5  ;;  %v794_v20 = vrot.slane %v2114_v55, 5  ;;  %v2343_v40 = vld [vmem:[%s2335_s10 + $0x4] sm:$0xf] }
  0x47   : > { %v2243_v51 = vpack.c.b16 %v818_v48, %v817_v45  ;;  %v822_v59 = vunpack.c.l.b16 %v784_v58  ;;  %v788_v6 = vsel %vm2201_vm7, %v1701_v2, %v787_v61  ;;  %v797_v18 = vrot.slane %v2122_v60, 5  ;;  %v2366_v61 = vld [vmem:[%s2335_s10 + $0x8] sm:$0x1] }
  0x48   : > { %v791_v19 = vsel %vm2201_vm7, %v789_v4, %v790_v5  ;;  %v823_v7 = vunpack.c.l.b16 %v788_v6  ;;  %v796_v15 = vrot.slane %v794_v20, 4  ;;  %v801_v23 = vrot.slane %v2043_v35, 5 }
  0x49   : > { %v2254_v29 = vpack.c.b16 %v822_v59, %v821_v57  ;;  %v824_v9 = vunpack.c.l.b16 %v791_v19  ;;  %v804_v28 = vrot.slane %v2054_v46, 5  ;;  %v1010_v10 = vshrl.u32 %v2340_v39, 16 }
  0x4a   : > { %v798_v55 = vsel %vm2201_vm7, %v796_v15, %v797_v18  ;;  %v803_v8 = vrot.slane %v801_v23, 4  ;;  %v1013_v11 = vshll.u32 %v2340_v39, 16  ;;  %v1019_v12 = vshll.u32 %v2343_v40, 16 }
  0x4b   : > { %1706 = vmatmul.msk.bf16.vlgmr.msrb.gmra.mxu2 %vm552_vm3, %v831_v31  ;;  %v2291_v17 = vpack.c.b16 %v824_v9, %v823_v7  ;;  %v1703_v31 = vrot.slane %v2036_v26, 9  ;;  %v808_v44 = vrot.slane %v2137_v27, 5  ;;  %v1023_v45 = vshrl.u32 %v2343_v40, 16 }
  0x4c   : > { %v805_v37 = vsel %vm2201_vm7, %v803_v8, %v804_v28  ;;  %v1012_v0 = vrot.slane %v1010_v10, 4  ;;  %v1015_v49 = vrot.slane %v1013_v11, 5  ;;  %v1021_v52 = vrot.slane %v1019_v12, 5  ;;  %v2398_v8 = vld [vmem:[%s2335_s10] sm:$0xff] }
  0x4d   : > { %v802_v35 = vsel %vm2201_vm7, %v1703_v31, %v801_v23  ;;  %v828_v46 = vunpack.c.l.b16 %v805_v37  ;;  %v1704_v56 = vrot.slane %v2126_v62, 9  ;;  %v810_v57 = vrot.slane %v808_v44, 4 }
  0x4e   : > { %v827_v26 = vunpack.c.l.b16 %v802_v35  ;;  %v811_v58 = vrot.slane %v2140_v30, 5  ;;  %v1025_v59 = vrot.slane %v1023_v45, 4  ;;  %v1016_v4 = vor.u32 %v1015_v49, %v1012_v0 }
  0x4f   : > { %1719 = vmatmul.msk.bf16.vlgmr.msrb.gmra.mxu3 %vm552_vm3, %v1781_v42  ;;  %v809_v5 = vsel %vm2201_vm7, %v1704_v56, %v808_v44  ;;  %v1029_v19 = vshll.u32 %v2366_v61, 16 }
  0x50   : > { %v812_v6 = vsel %vm2201_vm7, %v810_v57, %v811_v58  ;;  %v1026_v62 = vor.u32 %v1025_v59, %v1021_v52  ;;  %v829_v7 = vunpack.c.l.b16 %v809_v5 }
  0x51   : > { %v830_v9 = vunpack.c.l.b16 %v812_v6  ;;  %v1031_v18 = vrot.slane %v1029_v19, 5 }
  0x52   : > { %v1027_v15 = vrot.slane %v1026_v62, 4 }
  0x53   : > { %1728 = vmatmul.msk.bf16.vlgmr.msrb.gmra.mxu0 %vm552_vm3, %v545_v14  ;;  %v1702_v14 = vrot.slane %v2106_v41, 9  ;;  %v826_v41 = vunpack.c.l.b16 %v798_v55  ;;  %v2385_v55 = vpack.c.b16 %v830_v9, %v829_v7 }
  0x54   : > { %v1032_v23 = vsel %vm2047_vm4, %v1027_v15, %v1031_v18 }
  0x55   : > { %1690 = vmatmul.msk.bf16.gmra.mxu1 %vm552_vm3, %v1781_v42  ;;  %v795_v21 = vsel %vm2201_vm7, %v1702_v14, %v794_v20  ;;  %v2347_v42 = vpack.c.b16 %v828_v46, %v827_v26  ;;  %v1017_v14 = vrot.slane %v1016_v4, 4  ;;  %v1036_v35 = vunpack.c.l.b16 %v1032_v23 }
  0x56   : > { %v825_v22 = vunpack.c.l.b16 %v795_v21 }
  0x58   : > { %v2313_v60 = vpack.c.b16 %v826_v41, %v825_v22  ;;  %v1022_v41 = vsel %vm2047_vm4, %v1017_v14, %v1021_v52 }
  0x59   : > { %v1035_v28 = vunpack.c.l.b16 %v1022_v41 }
  0x5b   : > { %1707 = vmatmul.msk.bf16.gmra.mxu2 %vm552_vm3, %v2243_v51  ;;  %v2404_v26 = vpack.c.b16 %v1036_v35, %v1035_v28 }
  0x5f   : > { %1720 = vmatmul.msk.bf16.gmra.mxu3 %vm552_vm3, %v2252_v16 }
  0x63   : > { %1729 = vmatmul.msk.bf16.gmra.mxu0 %vm552_vm3, %v2066_v63 }
  0x65   : > { %1691 = vmatmul.msk.bf16.gmra.mxu1 %vm552_vm3, %v2252_v16 }
  0x6b   : > { %1708 = vmatmul.msk.bf16.gmra.mxu2 %vm552_vm3, %v2231_v43 }
  0x6f   : > { %1721 = vmatmul.msk.bf16.gmra.mxu3 %vm552_vm3, %v2265_v33 }
  0x73   : > { %1730 = vmatmul.msk.bf16.gmra.mxu0 %vm552_vm3, %v2152_v50 }
  0x75   : > { %1692 = vmatmul.msk.bf16.gmra.mxu1 %vm552_vm3, %v2265_v33 }
  0x7b   : > { %1709 = vmatmul.msk.bf16.gmra.mxu2 %vm552_vm3, %v2254_v29 }
  0x7f   : > { %1722 = vmatmul.msk.bf16.gmra.mxu3 %vm552_vm3, %v2277_v3 }
  0x83   : > { %1731 = vmatmul.msk.bf16.gmra.mxu0 %vm552_vm3, %v2089_v24 }
  0x85   : > { %1693 = vmatmul.msk.bf16.gmra.mxu1 %vm552_vm3, %v2277_v3 }
  0x8b   : > { %1710 = vmatmul.msk.bf16.gmra.mxu2 %vm552_vm3, %v2291_v17 }
  0x8f   : > { %1723 = vmatmul.msk.bf16.gmra.mxu3 %vm552_vm3, %v2297_v13 }
  0x93   : > { %1732 = vmatmul.msk.bf16.gmra.mxu0 %vm552_vm3, %v2174_v32 }
  0x95   : > { %1694 = vmatmul.msk.bf16.gmra.mxu1 %vm552_vm3, %v2297_v13 }
  0x9b   : > { %1711 = vmatmul.msk.bf16.gmra.mxu2 %vm552_vm3, %v2313_v60 }
  0x9f   : > { %1724 = vmatmul.msk.bf16.gmra.mxu3 %vm552_vm3, %v2320_v25 }
  0xa0   : > { %v2326_v34 = vpop.f32.mrf.mxu1 }
  0xa3   : > { %1733 = vmatmul.msk.bf16.gmra.mxu0 %vm552_vm3, %v2110_v47 }
  0xa5   : > { %1695 = vmatmul.msk.bf16.gmra.mxu1 %vm552_vm3, %v2320_v25 }
  0xa8   : > { %v2352_v53 = vpop.f32.mrf.mxu1 }
  0xaa   : > { %v2356_v48 = vpop.f32.mrf.mxu2 }
  0xab   : > { %1712 = vmatmul.msk.bf16.gmra.mxu2 %vm552_vm3, %v2347_v42 }
  0xae   : > { %v590_v27 = vpop.f32.mrf.mxu0  ;;  %v2368_v2 = vpop.f32.mrf.mxu3 }
  0xaf   : > { %1725 = vmatmul.msk.bf16.gmra.mxu3 %vm552_vm3, %v2361_v38 }
  0xb2   : > { %v2377_v30 = vpop.f32.mrf.mxu1  ;;  %v2381_v20 = vpop.f32.mrf.mxu2 }
  0xb3   : > { %1734 = vmatmul.msk.bf16.gmra.mxu0 %vm552_vm3, %v2196_v1 }
  0xb5   : > { %1696 = vmatmul.msk.bf16.gmra.mxu1 %vm552_vm3, %v2361_v38 }
  0xb6   : > { %v592_v21 = vpop.f32.mrf.mxu0  ;;  %v2387_v22 = vpop.f32.mrf.mxu3 }
  0xba   : > { %v2393_v31 = vpop.f32.mrf.mxu1 }
  0xbb   : > { %1713 = vmatmul.msk.bf16.gmra.mxu2 %vm552_vm3, %v2385_v55 }
  0xbe   : > { %v2400_v37 = vpop.f32.mrf.mxu2 }
  0xbf   : > { %1726 = vmatmul.msk.bf16.gmra.mxu3 %vm552_vm3, %v2398_v8 }
  0xc0   : > { %v595_v46 = vpop.f32.mrf.mxu0 }
  0xc2   : > { %v2406_v10 = vpop.f32.mrf.mxu3  ;;  %v706_v11 = vpop.f32.mrf.mxu1 }
  0xc3   : > { %1735 = vmatmul.msk.bf16.gmra.mxu0 %vm552_vm3, %v2404_v26  ;;  %v707_v12 = vadd.f32 %v706_v11, %v590_v27 }
  0xc5   : > { %1738 = vmatmul.msk.bf16.vlgmr.msra.gmra.mxu1 %vm552_vm3, %v2243_v51 }
  0xc6   : > { %v2412_v44 = vpop.f32.mrf.mxu2 }
  0xc8   : > { %v597_v45 = vpop.f32.mrf.mxu0 }
  0xca   : > { %v2414_v0 = vpop.f32.mrf.mxu3  ;;  %v708_v49 = vpop.f32.mrf.mxu1 }
  0xcb   : > { %1751 = vmatmul.msk.bf16.vlgmr.msra.gmra.mxu2 %vm552_vm3, %v2252_v16  ;;  %v709_v52 = vadd.f32 %v708_v49, %v592_v21 }
  0xce   : > { %v875_v56 = vpop.f32.mrf.mxu2 }
  0xcf   : > { %1760 = vmatmul.msk.bf16.vlgmr.msra.gmra.mxu3 %vm552_vm3, %v2066_v63  ;;  %v915_v57 = vadd.f32 %v875_v56, %v707_v12 }
  0xd0   : > { %v1053_v58 = vpop.f32.mrf.mxu0 }
  0xd2   : > { %v953_v59 = vpop.f32.mrf.mxu3  ;;  %v711_v27 = vpop.f32.mrf.mxu1 }
  0xd3   : > { %1770 = vmatmul.msk.bf16.vlgmr.msra.gmra.mxu0 %vm552_vm3, %v2231_v43  ;;  %v993_v51 = vadd.f32 %v953_v59, %v915_v57  ;;  %v712_v4 = vadd.f32 %v711_v27, %v595_v46 }
  0xd5   : > { %1739 = vmatmul.msk.bf16.gmra.mxu1 %vm552_vm3, %v2231_v43  ;;  %v2424_v5 = vadd.f32 %v1053_v58, %v993_v51 }
  0xd6   : > { %v877_v16 = vpop.f32.mrf.mxu2 }
  0xd7   : > { %v916_v6 = vadd.f32 %v877_v16, %v709_v52 }
  0xd8   : > { %v1055_v62 = vpop.f32.mrf.mxu0 }
  0xda   : > { %v955_v19 = vpop.f32.mrf.mxu3  ;;  %v713_v7 = vpop.f32.mrf.mxu1 }
  0xdb   : > { %v994_v63 = vadd.f32 %v955_v19, %v916_v6  ;;  %1752 = vmatmul.msk.bf16.gmra.mxu2 %vm552_vm3, %v2265_v33  ;;  %v714_v9 = vadd.f32 %v713_v7, %v597_v45 }
  0xdd   : > { %v2428_v14 = vadd.f32 %v1055_v62, %v994_v63 }
  0xde   : > { %v880_v15 = vpop.f32.mrf.mxu2 }
  0xdf   : > { %1761 = vmatmul.msk.bf16.gmra.mxu3 %vm552_vm3, %v2152_v50  ;;  %v917_v18 = vadd.f32 %v880_v15, %v712_v4 }
  0xe0   : > { %v1058_v43 = vpop.f32.mrf.mxu0 }
  0xe2   : > { %v958_v21 = vpop.f32.mrf.mxu3  ;;  %v716_v41 = vpop.f32.mrf.mxu1 }
  0xe3   : > { %1771 = vmatmul.msk.bf16.gmra.mxu0 %vm552_vm3, %v2254_v29  ;;  %v995_v23 = vadd.f32 %v958_v21, %v917_v18  ;;  %v717_v28 = vadd.f32 %v716_v41, %v2326_v34 }
  0xe5   : > { %1740 = vmatmul.msk.bf16.gmra.mxu1 %vm552_vm3, %v2254_v29  ;;  %v2437_v33 = vadd.f32 %v1058_v43, %v995_v23 }
  0xe6   : > { %v882_v35 = vpop.f32.mrf.mxu2 }
  0xe7   : > { %v918_v46 = vadd.f32 %v882_v35, %v714_v9 }
  0xe8   : > { %v1060_v11 = vpop.f32.mrf.mxu0 }
  0xea   : > { %v960_v12 = vpop.f32.mrf.mxu3  ;;  %v718_v50 = vpop.f32.mrf.mxu1 }
  0xeb   : > { %v996_v45 = vadd.f32 %v960_v12, %v918_v46  ;;  %1753 = vmatmul.msk.bf16.gmra.mxu2 %vm552_vm3, %v2277_v3  ;;  %v719_v49 = vadd.f32 %v718_v50, %v2352_v53 }
  0xed   : > { %v2442_v52 = vadd.f32 %v1060_v11, %v996_v45 }
  0xee   : > { %v885_v56 = vpop.f32.mrf.mxu2 }
  0xef   : > { %1762 = vmatmul.msk.bf16.gmra.mxu3 %vm552_vm3, %v2089_v24  ;;  %v919_v29 = vadd.f32 %v885_v56, %v717_v28 }
  0xf0   : > { %v1063_v34 = vpop.f32.mrf.mxu0 }
  0xf2   : > { %v963_v57 = vpop.f32.mrf.mxu3  ;;  %v721_v58 = vpop.f32.mrf.mxu1 }
  0xf3   : > { %1772 = vmatmul.msk.bf16.gmra.mxu0 %vm552_vm3, %v2291_v17  ;;  %v997_v59 = vadd.f32 %v963_v57, %v919_v29  ;;  %v722_v27 = vadd.f32 %v721_v58, %v2377_v30 }
  0xf5   : > { %1741 = vmatmul.msk.bf16.gmra.mxu1 %vm552_vm3, %v2291_v17  ;;  %v2451_v3 = vadd.f32 %v1063_v34, %v997_v59 }
  0xf6   : > { %v887_v53 = vpop.f32.mrf.mxu2 }
  0xf7   : > { %v920_v51 = vadd.f32 %v887_v53, %v719_v49  ;;  %v2489_v53 = vld [vmem:[%s2335_s10 + $0xc] sm:$0xf] }
  0xf8   : > { %v1065_v4 = vpop.f32.mrf.mxu0 }
  0xfa   : > { %v965_v16 = vpop.f32.mrf.mxu3  ;;  %v723_v24 = vpop.f32.mrf.mxu1 }
  0xfb   : > { %v998_v6 = vadd.f32 %v965_v16, %v920_v51  ;;  %1754 = vmatmul.msk.bf16.gmra.mxu2 %vm552_vm3, %v2297_v13  ;;  %v724_v62 = vadd.f32 %v723_v24, %v2393_v31  ;;  %v2492_v51 = vld [vmem:[%s2335_s10 + $0x10] sm:$0xf]  ;;  %v1272_v24 = vshrl.u32 %v2489_v53, 16 }
  0xfd   : > { %v2456_v19 = vadd.f32 %v1065_v4, %v998_v6  ;;  %v1736_v6 = vrot.slane %v2340_v39, 9 }
  0xfe   : > { %v890_v7 = vpop.f32.mrf.mxu2 }
  0xff   : > { %1763 = vmatmul.msk.bf16.gmra.mxu3 %vm552_vm3, %v2174_v32  ;;  %v921_v17 = vadd.f32 %v890_v7, %v722_v27  ;;  %v1112_v27 = vrot.slane %v2343_v40, 5  ;;  %v1285_v7 = vshrl.u32 %v2492_v51, 16 }
 0x100   : > { %v1068_v30 = vpop.f32.mrf.mxu0 }
 0x101   : > { %v1114_v40 = vrot.slane %v1112_v27, 4  ;;  %v1113_v39 = vsel %vm2201_vm7, %v1736_v6, %v1112_v27 }
 0x102   : > { %v968_v63 = vpop.f32.mrf.mxu3  ;;  %v726_v9 = vpop.f32.mrf.mxu1 }
 0x103   : > { %1773 = vmatmul.msk.bf16.gmra.mxu0 %vm552_vm3, %v2313_v60  ;;  %v999_v15 = vadd.f32 %v968_v63, %v921_v17  ;;  %v727_v32 = vadd.f32 %v726_v9, %v2356_v48  ;;  %v1274_v9 = vrot.slane %v1272_v24, 4  ;;  %v1789_v24 = vld [vmem:[%s2335_s10 + $0xc] sm:$0xff] }
 0x105   : > { %1742 = vmatmul.msk.bf16.gmra.mxu1 %vm552_vm3, %v2313_v60  ;;  %v2464_v13 = vadd.f32 %v1068_v30, %v999_v15 }
 0x106   : > { %v892_v31 = vpop.f32.mrf.mxu2 }
 0x107   : > { %v922_v18 = vadd.f32 %v892_v31, %v724_v62  ;;  %v1281_v62 = vshll.u32 %v2492_v51, 16 }
 0x108   : > { %v1070_v43 = vpop.f32.mrf.mxu0 }
 0x10a   : > { %v970_v21 = vpop.f32.mrf.mxu3  ;;  %v728_v41 = vpop.f32.mrf.mxu1 }
 0x10b   : > { %v1000_v23 = vadd.f32 %v970_v21, %v922_v18  ;;  %1755 = vmatmul.msk.bf16.gmra.mxu2 %vm552_vm3, %v2320_v25  ;;  %v729_v45 = vadd.f32 %v728_v41, %v2381_v20  ;;  %v1287_v21 = vrot.slane %v1285_v7, 4  ;;  %v329_v41 = vld [vmem:[%s2335_s10 + $0x14] sm:$0x1] }
 0x10d   : > { %v2469_v28 = vadd.f32 %v1070_v43, %v1000_v23  ;;  %v1283_v43 = vrot.slane %v1281_v62, 5 }
 0x10e   : > { %v895_v35 = vpop.f32.mrf.mxu2 }
 0x10f   : > { %1764 = vmatmul.msk.bf16.gmra.mxu3 %vm552_vm3, %v2110_v47  ;;  %v923_v60 = vadd.f32 %v895_v35, %v727_v32 }
 0x110   : > { %v1073_v46 = vpop.f32.mrf.mxu0 }
 0x112   : > { %v973_v11 = vpop.f32.mrf.mxu3  ;;  %v731_v12 = vpop.f32.mrf.mxu1 }
 0x113   : > { %1774 = vmatmul.msk.bf16.gmra.mxu0 %vm552_vm3, %v2347_v42  ;;  %v1001_v50 = vadd.f32 %v973_v11, %v923_v60  ;;  %v732_v57 = vadd.f32 %v731_v12, %v2400_v37  ;;  %v1291_v11 = vshll.u32 %v329_v41, 16 }
 0x115   : > { %1743 = vmatmul.msk.bf16.gmra.mxu1 %vm552_vm3, %v2347_v42  ;;  %v2478_v25 = vadd.f32 %v1073_v46, %v1001_v50  ;;  %v1288_v46 = vor.u32 %v1287_v21, %v1283_v43 }
 0x116   : > { %v897_v48 = vpop.f32.mrf.mxu2 }
 0x117   : > { %v924_v49 = vadd.f32 %v897_v48, %v729_v45 }
 0x118   : > { %v1075_v47 = vpop.f32.mrf.mxu0 }
 0x11a   : > { %v975_v56 = vpop.f32.mrf.mxu3  ;;  %v733_v29 = vpop.f32.mrf.mxu1 }
 0x11b   : > { %v1002_v34 = vadd.f32 %v975_v56, %v924_v49  ;;  %1756 = vmatmul.msk.bf16.gmra.mxu2 %vm552_vm3, %v2361_v38  ;;  %v1115_v38 = vrot.slane %v2366_v61, 5  ;;  %v734_v17 = vadd.f32 %v733_v29, %v2412_v44  ;;  %v1289_v29 = vrot.slane %v1288_v46, 4 }
 0x11d   : > { %v2483_v58 = vadd.f32 %v1075_v47, %v1002_v34  ;;  %v1116_v18 = vsel %vm2201_vm7, %v1114_v40, %v1115_v38  ;;  %v1293_v34 = vrot.slane %v1291_v11, 5 }
 0x11e   : > { %v900_v20 = vpop.f32.mrf.mxu2  ;;  %v1120_v35 = vunpack.c.l.b16 %v1116_v18 }
 0x11f   : > { %1765 = vmatmul.msk.bf16.gmra.mxu3 %vm552_vm3, %v2196_v1  ;;  %v925_v42 = vadd.f32 %v900_v20, %v732_v57  ;;  %v1275_v1 = vshll.u32 %v2489_v53, 16 }
 0x120   : > { %v1078_v59 = vpop.f32.mrf.mxu0 }
 0x121   : > { %v1277_v15 = vrot.slane %v1275_v1, 5 }
 0x122   : > { %v978_v4 = vpop.f32.mrf.mxu3  ;;  %v736_v16 = vpop.f32.mrf.mxu1 }
 0x123   : > { %1775 = vmatmul.msk.bf16.gmra.mxu0 %vm552_vm3, %v2385_v55  ;;  %v1003_v37 = vadd.f32 %v978_v4, %v925_v42  ;;  %v1278_v60 = vor.u32 %v1277_v15, %v1274_v9  ;;  %v737_v12 = vadd.f32 %v736_v16, %v2368_v2  ;;  %v1377_v4 = vrot.slane %v329_v41, 5 }
 0x125   : > { %1744 = vmatmul.msk.bf16.gmra.mxu1 %vm552_vm3, %v2385_v55  ;;  %v2505_v61 = vadd.f32 %v1078_v59, %v1003_v37  ;;  %v1119_v55 = vunpack.c.l.b16 %v1113_v39  ;;  %v1279_v47 = vrot.slane %v1278_v60, 4  ;;  %v1768_v59 = vrot.slane %v2489_v53, 9 }
 0x126   : > { %v902_v30 = vpop.f32.mrf.mxu2 }
 0x127   : > { %v926_v63 = vadd.f32 %v902_v30, %v734_v17  ;;  %v1121_v48 = vpack.c.b16 %v1120_v35, %v1119_v55  ;;  %v1284_v42 = vsel %vm2047_vm4, %v1279_v47, %v1283_v43 }
 0x128   : > { %v1080_v31 = vpop.f32.mrf.mxu0  ;;  %v1297_v1 = vunpack.c.l.b16 %v1284_v42 }
 0x12a   : > { %v980_v44 = vpop.f32.mrf.mxu3  ;;  %v738_v23 = vpop.f32.mrf.mxu1 }
 0x12b   : > { %v1004_v32 = vadd.f32 %v980_v44, %v926_v63  ;;  %1757 = vmatmul.msk.bf16.gmra.mxu2 %vm552_vm3, %v2398_v8  ;;  %v1374_v8 = vrot.slane %v2492_v51, 5  ;;  %v739_v16 = vadd.f32 %v738_v23, %v2387_v22 }
 0x12d   : > { %v2515_v50 = vadd.f32 %v1080_v31, %v1004_v32  ;;  %v1376_v27 = vrot.slane %v1374_v8, 4  ;;  %v1375_v36 = vsel %vm2201_vm7, %v1768_v59, %v1374_v8 }
 0x12e   : > { %v905_v45 = vpop.f32.mrf.mxu2  ;;  %v1381_v30 = vunpack.c.l.b16 %v1375_v36 }
 0x12f   : > { %1766 = vmatmul.msk.bf16.gmra.mxu3 %vm552_vm3, %v2404_v26  ;;  %v927_v49 = vadd.f32 %v905_v45, %v737_v12  ;;  %v1294_v26 = vsel %vm2047_vm4, %v1289_v29, %v1293_v34  ;;  %v1378_v53 = vsel %vm2201_vm7, %v1376_v27, %v1377_v4 }
 0x130   : > { %v1083_v56 = vpop.f32.mrf.mxu0  ;;  %v1298_v6 = vunpack.c.l.b16 %v1294_v26  ;;  %v1382_v63 = vunpack.c.l.b16 %v1378_v53 }
 0x132   : > { %v983_v57 = vpop.f32.mrf.mxu3  ;;  %v741_v20 = vpop.f32.mrf.mxu1  ;;  %v1299_v22 = vpack.c.b16 %v1298_v6, %v1297_v1  ;;  %v1383_v39 = vpack.c.b16 %v1382_v63, %v1381_v30 }
 0x133   : > { %1776 = vmatmul.msk.bf16.gmra.mxu0 %vm552_vm3, %v1121_v48  ;;  %v1005_v2 = vadd.f32 %v983_v57, %v927_v49  ;;  %v742_v9 = vadd.f32 %v741_v20, %v2406_v10 }
 0x135   : > { %1745 = vmatmul.msk.bf16.gmra.mxu1 %vm552_vm3, %v1121_v48  ;;  %v2528_v51 = vadd.f32 %v1083_v56, %v1005_v2  ;;  %v2552_v2 = vld [vmem:[%s2616_s3] ss:$0 sm:$0xff] }
 0x136   : > { %v907_v38 = vpop.f32.mrf.mxu2 }
 0x137   : > { %v928_v37 = vadd.f32 %v907_v38, %v739_v16 }
 0x138   : > { %v1085_v40 = vpop.f32.mrf.mxu0 }
 0x13a   : > { %v985_v62 = vpop.f32.mrf.mxu3  ;;  %v743_v7 = vpop.f32.mrf.mxu1 }
 0x13b   : > { %v1006_v17 = vadd.f32 %v985_v62, %v928_v37  ;;  %1758 = vmatmul.msk.bf16.gmra.mxu2 %vm552_vm3, %v1789_v24  ;;  %v744_v44 = vadd.f32 %v743_v7, %v2414_v0 }
 0x13d   : > { %v2537_v15 = vadd.f32 %v1085_v40, %v1006_v17 }
 0x13e   : > { %v910_v31 = vpop.f32.mrf.mxu2 }
 0x13f   : > { %1767 = vmatmul.msk.bf16.gmra.mxu3 %vm552_vm3, %v1299_v22  ;;  %v929_v18 = vadd.f32 %v910_v31, %v742_v9 }
 0x140   : > { %v1088_v43 = vpop.f32.mrf.mxu0 }
 0x142   : > { %v988_v54 = vpop.f32.mrf.mxu3  ;;  %v1137_v21 = vpop.f32.mrf.mxu1 }
 0x143   : > { %1777 = vmatmul.msk.bf16.gmra.mxu0 %vm552_vm3, %v1383_v39  ;;  %v1007_v41 = vadd.f32 %v988_v54, %v929_v18  ;;  %v1177_v45 = vadd.f32 %v1137_v21, %v2424_v5 }
 0x145   : > { %v2542_v23 = vadd.f32 %v1088_v43, %v1007_v41 }
 0x146   : > { %v912_v32 = vpop.f32.mrf.mxu2 }
 0x147   : > { %v930_v10 = vadd.f32 %v912_v32, %v744_v44 }
 0x148   : > { %v1090_v55 = vpop.f32.mrf.mxu0 }
 0x14a   : > { %v990_v35 = vpop.f32.mrf.mxu3  ;;  %v1139_v60 = vpop.f32.mrf.mxu1 }
 0x14b   : > { %v1008_v46 = vadd.f32 %v990_v35, %v930_v10  ;;  %v1178_v29 = vadd.f32 %v1139_v60, %v2428_v14 }
 0x14d   : > { %v2544_v11 = vadd.f32 %v1090_v55, %v1008_v46 }
 0x14e   : > { %v1215_v12 = vpop.f32.mrf.mxu2 }
 0x14f   : > { %v1255_v49 = vadd.f32 %v1215_v12, %v1177_v45 }
 0x150   : > { %v1399_v48 = vpop.f32.mrf.mxu0 }
 0x152   : > { %v1315_v47 = vpop.f32.mrf.mxu3  ;;  %v1142_v56 = vpop.f32.mrf.mxu1 }
 0x153   : > { %v1355_v0 = vadd.f32 %v1315_v47, %v1255_v49  ;;  %v1179_v16 = vadd.f32 %v1142_v56, %v2437_v33 }
 0x155   : > { %v1439_v20 = vadd.f32 %v1399_v48, %v1355_v0 }
 0x156   : > { %v1217_v34 = vpop.f32.mrf.mxu2 }
 0x157   : > { %v1256_v8 = vadd.f32 %v1217_v34, %v1178_v29  ;;  %v1459_v59 = vadd.f32 %v2552_v2, %v1439_v20 }
 0x158   : > { %v1401_v57 = vpop.f32.mrf.mxu0 }
 0x159   : > { %v1475_v37 = vmax.f32 %v1459_v59, 0.0 }
 0x15a   : > { %v1317_v5 = vpop.f32.mrf.mxu3  ;;  %v1144_v42 = vpop.f32.mrf.mxu1 }
 0x15b   : > { %v1356_v26 = vadd.f32 %v1317_v5, %v1256_v8  ;;  %v1180_v62 = vadd.f32 %v1144_v42, %v2442_v52 }
 0x15d   : > { %v1440_v27 = vadd.f32 %v1401_v57, %v1356_v26 }
 0x15e   : > { %v1220_v4 = vpop.f32.mrf.mxu2 }
 0x15f   : > { %v1460_v14 = vadd.f32 %v2552_v2, %v1440_v27  ;;  %v1257_v1 = vadd.f32 %v1220_v4, %v1179_v16 }
 0x160   : > { %v1404_v38 = vpop.f32.mrf.mxu0 }
 0x161   : > { %v1476_v24 = vmax.f32 %v1460_v14, 0.0 }
 0x162   : > { %v1320_v6 = vpop.f32.mrf.mxu3  ;;  %v1147_v40 = vpop.f32.mrf.mxu1 }
 0x163   : > { %v1793_v36 = vpack.c.bf16 %v1476_v24, %v1475_v37  ;;  %v1357_v53 = vadd.f32 %v1320_v6, %v1257_v1  ;;  %v1181_v54 = vadd.f32 %v1147_v40, %v2451_v3 }
 0x165   : > { %1794 = vst [vmem:[%s2561_s16] sm:$0xff] %v1793_v36   ;;  %v1441_v22 = vadd.f32 %v1404_v38, %v1357_v53 }
 0x166   : > { %v1222_v7 = vpop.f32.mrf.mxu2 }
 0x167   : > { %v1258_v17 = vadd.f32 %v1222_v7, %v1180_v62  ;;  %v1461_v31 = vadd.f32 %v2552_v2, %v1441_v22 }
 0x168   : > { %v1406_v33 = vpop.f32.mrf.mxu0 }
 0x169   : > { %v1477_v41 = vmax.f32 %v1461_v31, 0.0 }
 0x16a   : > { %v1322_v30 = vpop.f32.mrf.mxu3  ;;  %v1149_v63 = vpop.f32.mrf.mxu1 }
 0x16b   : > { %v1358_v9 = vadd.f32 %v1322_v30, %v1258_v17  ;;  %v1182_v60 = vadd.f32 %v1149_v63, %v2456_v19 }
 0x16d   : > { %v1442_v39 = vadd.f32 %v1406_v33, %v1358_v9 }
 0x16e   : > { %v1225_v18 = vpop.f32.mrf.mxu2 }
 0x16f   : > { %v1462_v43 = vadd.f32 %v2552_v2, %v1442_v39  ;;  %v1259_v52 = vadd.f32 %v1225_v18, %v1181_v54 }
 0x170   : > { %v1409_v21 = vpop.f32.mrf.mxu0 }
 0x171   : > { %v1478_v44 = vmax.f32 %v1462_v43, 0.0 }
 0x172   : > { %v1325_v32 = vpop.f32.mrf.mxu3  ;;  %v1152_v10 = vpop.f32.mrf.mxu1 }
 0x173   : > { %v1798_v55 = vpack.c.bf16 %v1478_v44, %v1477_v41  ;;  %v1359_v35 = vadd.f32 %v1325_v32, %v1259_v52  ;;  %v1183_v8 = vadd.f32 %v1152_v10, %v2464_v13 }
 0x175   : > { %1830 = vst [vmem:[%s2561_s16 + $0x8] sm:$0xff] %v1798_v55   ;;  %v1443_v48 = vadd.f32 %v1409_v21, %v1359_v35 }
 0x176   : > { %v1227_v46 = vpop.f32.mrf.mxu2 }
 0x177   : > { %v1260_v12 = vadd.f32 %v1227_v46, %v1182_v60  ;;  %v1463_v3 = vadd.f32 %v2552_v2, %v1443_v48 }
 0x178   : > { %v1411_v45 = vpop.f32.mrf.mxu0 }
 0x179   : > { %v1479_v20 = vmax.f32 %v1463_v3, 0.0 }
 0x17a   : > { %v1327_v49 = vpop.f32.mrf.mxu3  ;;  %v1154_v47 = vpop.f32.mrf.mxu1 }
 0x17b   : > { %v1360_v56 = vadd.f32 %v1327_v49, %v1260_v12  ;;  %v1184_v4 = vadd.f32 %v1154_v47, %v2469_v28 }
 0x17d   : > { %v1444_v0 = vadd.f32 %v1411_v45, %v1360_v56 }
 0x17e   : > { %v1230_v29 = vpop.f32.mrf.mxu2 }
 0x17f   : > { %v1464_v34 = vadd.f32 %v2552_v2, %v1444_v0  ;;  %v1261_v19 = vadd.f32 %v1230_v29, %v1183_v8 }
 0x180   : > { %v1414_v57 = vpop.f32.mrf.mxu0 }
 0x181   : > { %v1480_v5 = vmax.f32 %v1464_v34, 0.0 }
 0x182   : > { %v1330_v42 = vpop.f32.mrf.mxu3  ;;  %v1157_v26 = vpop.f32.mrf.mxu1 }
 0x183   : > { %v1803_v59 = vpack.c.bf16 %v1480_v5, %v1479_v20  ;;  %v1361_v27 = vadd.f32 %v1330_v42, %v1261_v19  ;;  %v1185_v62 = vadd.f32 %v1157_v26, %v2478_v25 }
 0x185   : > { %1831 = vst [vmem:[%s2561_s16 + $0x10] sm:$0xff] %v1803_v59   ;;  %v1445_v37 = vadd.f32 %v1414_v57, %v1361_v27 }
 0x186   : > { %v1232_v14 = vpop.f32.mrf.mxu2 }
 0x187   : > { %v1262_v16 = vadd.f32 %v1232_v14, %v1184_v4  ;;  %v1465_v13 = vadd.f32 %v2552_v2, %v1445_v37 }
 0x188   : > { %v1416_v38 = vpop.f32.mrf.mxu0 }
 0x189   : > { %v1481_v17 = vmax.f32 %v1465_v13, 0.0 }
 0x18a   : > { %v1332_v24 = vpop.f32.mrf.mxu3  ;;  %v1159_v1 = vpop.f32.mrf.mxu1 }
 0x18b   : > { %v1362_v6 = vadd.f32 %v1332_v24, %v1262_v16  ;;  %v1186_v31 = vadd.f32 %v1159_v1, %v2483_v58 }
 0x18d   : > { %v1446_v40 = vadd.f32 %v1416_v38, %v1362_v6 }
 0x18e   : > { %v1235_v36 = vpop.f32.mrf.mxu2 }
 0x18f   : > { %v1466_v53 = vadd.f32 %v2552_v2, %v1446_v40  ;;  %v1263_v28 = vadd.f32 %v1235_v36, %v1185_v62 }
 0x190   : > { %v1419_v7 = vpop.f32.mrf.mxu0 }
 0x191   : > { %v1482_v33 = vmax.f32 %v1466_v53, 0.0 }
 0x192   : > { %v1335_v22 = vpop.f32.mrf.mxu3  ;;  %v1162_v30 = vpop.f32.mrf.mxu1 }
 0x193   : > { %v1808_v63 = vpack.c.bf16 %v1482_v33, %v1481_v17  ;;  %v1363_v9 = vadd.f32 %v1335_v22, %v1263_v28  ;;  %v1187_v55 = vadd.f32 %v1162_v30, %v2505_v61 }
 0x195   : > { %1832 = vst [vmem:[%s2561_s16 + $0x18] sm:$0xff] %v1808_v63   ;;  %v1447_v54 = vadd.f32 %v1419_v7, %v1363_v9 }
 0x196   : > { %v1237_v39 = vpop.f32.mrf.mxu2 }
 0x197   : > { %v1264_v18 = vadd.f32 %v1237_v39, %v1186_v31  ;;  %v1467_v25 = vadd.f32 %v2552_v2, %v1447_v54 }
 0x198   : > { %v1421_v43 = vpop.f32.mrf.mxu0 }
 0x199   : > { %v1483_v60 = vmax.f32 %v1467_v25, 0.0 }
 0x19a   : > { %v1337_v21 = vpop.f32.mrf.mxu3  ;;  %v1164_v41 = vpop.f32.mrf.mxu1 }
 0x19b   : > { %v1364_v44 = vadd.f32 %v1337_v21, %v1264_v18  ;;  %v1188_v47 = vadd.f32 %v1164_v41, %v2515_v50 }
 0x19d   : > { %v1448_v52 = vadd.f32 %v1421_v43, %v1364_v44 }
 0x19e   : > { %v1240_v32 = vpop.f32.mrf.mxu2 }
 0x19f   : > { %v1468_v10 = vadd.f32 %v2552_v2, %v1448_v52  ;;  %v1265_v58 = vadd.f32 %v1240_v32, %v1187_v55 }
 0x1a0   : > { %v1424_v35 = vpop.f32.mrf.mxu0 }
 0x1a1   : > { %v1484_v46 = vmax.f32 %v1468_v10, 0.0 }
 0x1a2   : > { %v1340_v12 = vpop.f32.mrf.mxu3  ;;  %v1167_v48 = vpop.f32.mrf.mxu1 }
 0x1a3   : > { %v1813_v45 = vpack.c.bf16 %v1484_v46, %v1483_v60  ;;  %v1365_v49 = vadd.f32 %v1340_v12, %v1265_v58  ;;  %v1189_v42 = vadd.f32 %v1167_v48, %v2528_v51 }
 0x1a5   : > { %1833 = vst [vmem:[%s2561_s16 + $0x20] sm:$0xff] %v1813_v45   ;;  %v1449_v29 = vadd.f32 %v1424_v35, %v1365_v49 }
 0x1a6   : > { %v1242_v56 = vpop.f32.mrf.mxu2 }
 0x1a7   : > { %v1266_v3 = vadd.f32 %v1242_v56, %v1188_v47  ;;  %v1469_v61 = vadd.f32 %v2552_v2, %v1449_v29 }
 0x1a8   : > { %v1426_v0 = vpop.f32.mrf.mxu0 }
 0x1a9   : > { %v1485_v59 = vmax.f32 %v1469_v61, 0.0 }
 0x1aa   : > { %v1342_v34 = vpop.f32.mrf.mxu3  ;;  %v1169_v20 = vpop.f32.mrf.mxu1 }
 0x1ab   : > { %v1366_v8 = vadd.f32 %v1342_v34, %v1266_v3  ;;  %v1190_v38 = vadd.f32 %v1169_v20, %v2537_v15 }
 0x1ad   : > { %v1450_v57 = vadd.f32 %v1426_v0, %v1366_v8 }
 0x1ae   : > { %v1245_v5 = vpop.f32.mrf.mxu2 }
 0x1af   : > { %v1470_v19 = vadd.f32 %v2552_v2, %v1450_v57  ;;  %v1267_v50 = vadd.f32 %v1245_v5, %v1189_v42 }
 0x1b0   : > { %v1429_v26 = vpop.f32.mrf.mxu0 }
 0x1b1   : > { %v1486_v27 = vmax.f32 %v1470_v19, 0.0 }
 0x1b2   : > { %v1345_v4 = vpop.f32.mrf.mxu3  ;;  %v1172_v1 = vpop.f32.mrf.mxu1 }
 0x1b3   : > { %v1818_v14 = vpack.c.bf16 %v1486_v27, %v1485_v59  ;;  %v1367_v16 = vadd.f32 %v1345_v4, %v1267_v50  ;;  %v1191_v17 = vadd.f32 %v1172_v1, %v2542_v23 }
 0x1b5   : > { %1834 = vst [vmem:[%s2561_s16 + $0x28] sm:$0xff] %v1818_v14   ;;  %v1451_v13 = vadd.f32 %v1429_v26, %v1367_v16 }
 0x1b6   : > { %v1247_v37 = vpop.f32.mrf.mxu2 }
 0x1b7   : > { %v1268_v24 = vadd.f32 %v1247_v37, %v1190_v38  ;;  %v1471_v51 = vadd.f32 %v2552_v2, %v1451_v13 }
 0x1b8   : > { %v1431_v6 = vpop.f32.mrf.mxu0 }
 0x1b9   : > { %v1487_v33 = vmax.f32 %v1471_v51, 0.0 }
 0x1ba   : > { %v1347_v40 = vpop.f32.mrf.mxu3  ;;  %v1174_v15 = vpop.f32.mrf.mxu1 }
 0x1bb   : > { %v1368_v36 = vadd.f32 %v1347_v40, %v1268_v24  ;;  %v1192_v39 = vadd.f32 %v1174_v15, %v2544_v11 }
 0x1bd   : > { %v1452_v53 = vadd.f32 %v1431_v6, %v1368_v36 }
 0x1be   : > { %v1250_v62 = vpop.f32.mrf.mxu2 }
 0x1bf   : > { %v1472_v7 = vadd.f32 %v2552_v2, %v1452_v53  ;;  %v1269_v22 = vadd.f32 %v1250_v62, %v1191_v17 }
 0x1c0   : > { %v1434_v30 = vpop.f32.mrf.mxu0 }
 0x1c1   : > { %v1488_v28 = vmax.f32 %v1472_v7, 0.0 }
 0x1c2   : > { %v1350_v63 = vpop.f32.mrf.mxu3 }
 0x1c3   : > { %v1823_v9 = vpack.c.bf16 %v1488_v28, %v1487_v33  ;;  %v1369_v31 = vadd.f32 %v1350_v63, %v1269_v22 }
 0x1c5   : > { %1835 = vst [vmem:[%s2561_s16 + $0x30] sm:$0xff] %v1823_v9   ;;  %v1453_v54 = vadd.f32 %v1434_v30, %v1369_v31 }
 0x1c6   : > { %v1252_v18 = vpop.f32.mrf.mxu2 }
 0x1c7   : > { %v1270_v43 = vadd.f32 %v1252_v18, %v1192_v39  ;;  %v1473_v23 = vadd.f32 %v2552_v2, %v1453_v54 }
 0x1c8   : > { %v1436_v44 = vpop.f32.mrf.mxu0 }
 0x1c9   : > { %v1489_v32 = vmax.f32 %v1473_v23, 0.0 }
 0x1ca   : > { %v1352_v21 = vpop.f32.mrf.mxu3 }
 0x1cb   : > { %v1370_v41 = vadd.f32 %v1352_v21, %v1270_v43 }
 0x1cd   : > { %v1454_v25 = vadd.f32 %v1436_v44, %v1370_v41 }
 0x1cf   : > { %v1474_v52 = vadd.f32 %v2552_v2, %v1454_v25 }
 0x1d1   : > { %v1490_v10 = vmax.f32 %v1474_v52, 0.0 }
 0x1d3   : > { %v1828_v55 = vpack.c.bf16 %v1490_v10, %v1489_v32 }
 0x1d5   : > { %1836 = vst [vmem:[%s2561_s16 + $0x38] sm:$0xff] %v1828_v55  }
 0x1d6 PF: > { %s14_s19 = sadd.s32 1, %s1923_s19   ;;  %s2622_s15 = smov %s1915_s17 }
 0x1d7   : > { %p11_p9 = scmp.ge.s32.totalorder %s14_s19, 6   ;;  %s2623_s16 = smov %s1919_s18 }
 0x1d8   : > { %s2624_s17 = smov %s2627_s20  ;;  %s2625_s18 = smov %s2631_s21 }
 0x1d9   :  { %13 = sbr.rel (!%p11_p9) target bundleno = 3 (0x3), region = 77 }

</bundles_post_ra>
